<compile_context>
chip_gen: v7x
topology: tpu7x:2x2x1
jax: 0.10.0
libtpu: 0.0.40
codegen_flags: <defaults>
</compile_context>

<pallas_src>
import numpy as np
import jax
import jax.numpy as jnp
from jax import lax
from jax.experimental import pallas as pl
from jax.experimental.pallas import tpu as pltpu


def _decoder_kernel(qt_ref, w1_ref, b1_ref, x_ref, t_ref,
                    yl_ref, alpha_ref, m_ref):
    TB, N, D = x_ref.shape
    TY = qt_ref.shape[1]

    x = x_ref[...]                                        # (TB, N, D) bf16
    qt = qt_ref[...]                                      # (D, TY)    bf16

    # scores: one folded MXU matmul, batch folded into the MXU row dimension.
    s = lax.dot_general(x.reshape(TB * N, D), qt,
                        (((1,), (0,)), ((), ())),
                        preferred_element_type=jnp.float32)   # (TB*N, TY)
    s = s.reshape(TB, N, TY)

    # softmax over the sequence axis (torch dim=2); divide on the EUP.
    smax = jnp.max(s, axis=1, keepdims=True)              # (TB, 1, TY)
    e = jnp.exp(s - smax)
    denom = jnp.sum(e, axis=1, keepdims=True)
    alpha = e * pl.reciprocal(denom, approx=True)         # (TB, N, TY) f32

    # alpha output in the module's (B, Y, N) layout (one XLU transpose).
    alpha_t = jnp.swapaxes(alpha, 1, 2)                   # (TB, TY, N)
    alpha_ref[...] = alpha_t.astype(alpha_ref.dtype)      # bf16 writeback

    # m = alpha @ x  (batched MXU matmul, f32 accumulation)
    m = jnp.einsum('tyn,tnd->tyd', alpha_t.astype(jnp.bfloat16), x,
                   preferred_element_type=jnp.float32)    # (TB, TY, D)
    m_ref[...] = m.astype(m_ref.dtype)                    # bf16 writeback

    # y = sum(W1 * m, dim=-1) + b1   (W1 is bf16, promoted to f32 by the multiply)
    y = jnp.sum(w1_ref[...] * m, axis=-1) + b1_ref[...]   # (TB, TY) f32

    # elementwise BCE-with-logits (stable form); mean reduction done in the wrapper.
    t = t_ref[...][:, 0, :]                               # (TB, TY)
    lelem = jnp.maximum(y, 0.0) - y * t + jnp.log1p(jnp.exp(-jnp.abs(y)))

    # packed [y ; bce_elem] slab.
    yl_ref[:, 0:1, :] = y[:, None, :].astype(yl_ref.dtype)
    yl_ref[:, 1:2, :] = lelem[:, None, :].astype(yl_ref.dtype)


def _vmem_caps():
    """Generation-aware (vmem_limit_bytes, per-step working-set budget)."""
    cap = 64 << 20
    try:
        info = pltpu.get_tpu_info()
        cap = int(getattr(info, "vmem_capacity_bytes", 0)) or cap
    except Exception:
        pass                                              # fall back to conservative 64 MiB
    if cap <= (64 << 20):                                 # v7x-class: 64 MiB VMEM per TC
        return 40 << 20, 18 << 20
    return 100 << 20, 48 << 20                            # v5e / v6e: 128 MiB VMEM


def _pick_tb(B, N, D, Y, ws_budget, out_bytes):
    """Largest tb that divides B, fits the double-buffered per-step working set in
    ws_budget, and leaves >= 2 grid steps (v7x megacore / pipelining)."""
    per_b = 2 * (2 * N * D                                # x block (bf16), double-buffered
                 + 4 * Y                                  # target block (f32)
                 + out_bytes * (Y * N + Y * D)            # alpha + m output blocks
                 + 4 * 2 * Y)                             # packed y / BCE output (f32)
    per_b += 4 * (4 * N * Y + 2 * Y * D)                  # in-kernel f32 temporaries (approx)
    fixed = 2 * 2 * (D * Y + Y * D) + 4 * Y               # qT, W1 (bf16, dbl-buffered), b1
    cap = max(1, (ws_budget - fixed) // max(per_b, 1))
    if B >= 2:
        cap = min(cap, B // 2)                            # keep >= 2 parallel grid steps
    tb = 1
    for cand in range(1, B + 1):
        if B % cand == 0 and cand <= cap:
            tb = cand
    return tb


def decoder_forward(params, x, target, tb=None, ty=None, out_dtype=jnp.bfloat16):
    """params: W0 (Y,D), hb (Y,H), WhT (H,D), bh (1,D), W1 (Y,D), b1 (Y,)."""
    W0, hb, WhT, bh, W1, b1 = (params["W0"], params["hb"], params["WhT"],
                               params["bh"], params["W1"], params["b1"])
    B, N, D = x.shape
    Y = W0.shape[0]

    # Hoisted batch-invariant hyperbolic query correction (runs once, plain XLA).
    query = W0 + hb @ WhT + bh                            # (Y, D)
    qT = jnp.asarray(query.T, jnp.bfloat16)               # (D, Y) bf16 MXU input
    W1b = jnp.asarray(W1, jnp.bfloat16)
    xb = jnp.asarray(x, jnp.bfloat16)

    vmem_limit, ws_budget = _vmem_caps()
    out_bytes = jnp.dtype(out_dtype).itemsize
    if tb is None:
        tb = _pick_tb(B, N, D, Y, ws_budget, out_bytes)
    assert B % tb == 0
    if ty is None:
        ty = Y
    # Y tiling only when it stays lane-dense (unmasked (…, ty) weight loads).
    assert ty == Y or (Y % ty == 0 and ty % 128 == 0)

    b1_row = b1.reshape(1, Y).astype(jnp.float32)
    t3 = target.reshape(B, 1, Y).astype(jnp.float32)
    grid = (B // tb, Y // ty)

    out_shapes = (
        jax.ShapeDtypeStruct((B, 2, Y), jnp.float32),     # packed [y ; BCE elements]
        jax.ShapeDtypeStruct((B, Y, N), out_dtype),       # alpha
        jax.ShapeDtypeStruct((B, Y, D), out_dtype),       # m
    )
    in_specs = [
        pl.BlockSpec((D, ty), lambda g, h: (0, h)),       # query^T (batch-invariant)
        pl.BlockSpec((ty, D), lambda g, h: (h, 0)),       # W1
        pl.BlockSpec((1, ty), lambda g, h: (0, h)),       # b1
        pl.BlockSpec((tb, N, D), lambda g, h: (g, 0, 0)), # x
        pl.BlockSpec((tb, 1, ty), lambda g, h: (g, 0, h)),# target
    ]
    out_specs = (
        pl.BlockSpec((tb, 2, ty), lambda g, h: (g, 0, h)),# packed y / BCE
        pl.BlockSpec((tb, ty, N), lambda g, h: (g, h, 0)),# alpha
        pl.BlockSpec((tb, ty, D), lambda g, h: (g, h, 0)),# m
    )

    yl, alpha, m = pl.pallas_call(
        _decoder_kernel,
        out_shape=out_shapes,
        grid=grid,
        in_specs=in_specs,
        out_specs=out_specs,
        compiler_params=pltpu.CompilerParams(
            dimension_semantics=("parallel", "parallel"),
            vmem_limit_bytes=vmem_limit),
    )(qT, W1b, b1_row, xb, t3)

    y = yl[:, 0, :]                                       # (B, Y) f32
    loss = jnp.mean(yl[:, 1, :])                          # BCEWithLogitsLoss mean reduction
    return y, loss, alpha, m


def reference_forward(params, x, target):
    W0, hb, WhT, bh, W1, b1 = (params["W0"], params["hb"], params["WhT"],
                               params["bh"], params["W1"], params["b1"])
    query = W0 + hb @ WhT + bh                            # (Y, D)
    scores = jnp.einsum("yd,bnd->byn", query, x)
    alpha = jax.nn.softmax(scores, axis=2)
    m = jnp.einsum("byn,bnd->byd", alpha, x)
    y = jnp.sum(W1[None] * m, axis=2) + b1[None, :]
    loss_el = jnp.maximum(y, 0.0) - y * target + jnp.log1p(jnp.exp(-jnp.abs(y)))
    return y, jnp.mean(loss_el), alpha, m


def init_params(key, Y, D, H):
    k = jax.random.split(key, 6)
    xav = float(np.sqrt(6.0 / (D + Y)))          # xavier_uniform on (Y, D) Linear weights
    lin_h = float(1.0 / np.sqrt(H))              # default nn.Linear init for (H -> D)
    lin_d = float(1.0 / np.sqrt(D))              # default nn.Linear bias init for (D -> Y)
    W0 = jax.random.uniform(k[0], (Y, D), jnp.float32, -xav, xav)
    W1 = jax.random.uniform(k[1], (Y, D), jnp.float32, -xav, xav)
    b1 = jax.random.uniform(k[2], (Y,), jnp.float32, -lin_d, lin_d)
    Wh = jax.random.uniform(k[3], (D, H), jnp.float32, -lin_h, lin_h)   # nn.Linear(H, D).weight
    bh = jax.random.uniform(k[4], (1, D), jnp.float32, -lin_h, lin_h)
    hb = jax.random.uniform(k[5], (Y, H), jnp.float32, -0.1, 0.1)       # synthetic Poincare embeddings
    # TODO(synk): change_depth() weight-copying across hierarchy levels is a state
    # mutation outside the forward pass; not modeled here.
    return {"W0": W0, "hb": hb, "WhT": Wh.T, "bh": bh, "W1": W1, "b1": b1}


def _np32(a):
    return np.asarray(jnp.asarray(a, jnp.float32))


if __name__ == "__main__":
    B, N, D, Y, H = 8, 8, 32, 16, 8
    key = jax.random.PRNGKey(0)
    kp, kx, kt = jax.random.split(key, 3)

    params = init_params(kp, Y, D, H)
    x = jax.random.normal(kx, (B, N, D), jnp.float32)
    target = jax.random.bernoulli(kt, 0.3, (B, Y)).astype(jnp.float32)

    # tb=2 -> grid (4, 1): exercises pipelining / index maps and keeps >=2 parallel steps.
    y, loss, alpha, m = decoder_forward(params, x, target, tb=2)
    jax.block_until_ready((y, loss, alpha, m))

    y_r, loss_r, alpha_r, m_r = reference_forward(params, x, target)
    # bf16 matmul inputs + bf16 alpha/m writeback (f32 accumulation) -> relaxed tolerances.
    assert np.allclose(_np32(y), _np32(y_r), atol=5e-2, rtol=5e-2)
    assert np.allclose(_np32(alpha), _np32(alpha_r), atol=2e-2, rtol=5e-2)
    assert np.allclose(_np32(m), _np32(m_r), atol=5e-2, rtol=5e-2)
    assert np.allclose(float(loss), float(loss_r), atol=5e-2, rtol=5e-2)

    print("KERNEL_OK")
</pallas_src>

<mosaic_0001>
module attributes {stable_mosaic.version = 11 : i64} {
  func.func @_decoder_kernel(%arg0: i32, %arg1: i32, %arg2: memref<32x16xbf16, #tpu.memory_space<vmem>>, %arg3: memref<16x32xbf16, #tpu.memory_space<vmem>>, %arg4: memref<1x16xf32, #tpu.memory_space<vmem>>, %arg5: memref<2x8x32xbf16, #tpu.memory_space<vmem>>, %arg6: memref<2x1x16xf32, #tpu.memory_space<vmem>>, %arg7: memref<2x2x16xf32, #tpu.memory_space<vmem>>, %arg8: memref<2x16x8xbf16, #tpu.memory_space<vmem>>, %arg9: memref<2x16x32xbf16, #tpu.memory_space<vmem>>) attributes {dimension_semantics = [#tpu.dimension_semantics<parallel>, #tpu.dimension_semantics<parallel>], iteration_bounds = array<i64: 4, 1>, scalar_prefetch = 0 : i64, scratch_operands = 0 : i64, tpu.core_type = #tpu.core_type<tc>, window_params = [{transform_indices = @transform_0, window_bounds = array<i64: 32, 16>}, {transform_indices = @transform_1, window_bounds = array<i64: 16, 32>}, {transform_indices = @transform_2, window_bounds = array<i64: 1, 16>}, {transform_indices = @transform_3, window_bounds = array<i64: 2, 8, 32>}, {transform_indices = @transform_4, window_bounds = array<i64: 2, 1, 16>}, {transform_indices = @transform_5, window_bounds = array<i64: 2, 2, 16>}, {transform_indices = @transform_6, window_bounds = array<i64: 2, 16, 8>}, {transform_indices = @transform_7, window_bounds = array<i64: 2, 16, 32>}]} {
    %c0 = arith.constant 0 : index
    %c0_0 = arith.constant 0 : index
    %c0_1 = arith.constant 0 : index
    %0 = vector.load %arg5[%c0, %c0_0, %c0_1] : memref<2x8x32xbf16, #tpu.memory_space<vmem>>, vector<2x8x32xbf16>
    %c0_2 = arith.constant 0 : index
    %c0_3 = arith.constant 0 : index
    %1 = vector.load %arg2[%c0_2, %c0_3] : memref<32x16xbf16, #tpu.memory_space<vmem>>, vector<32x16xbf16>
    %2 = vector.shape_cast %0 : vector<2x8x32xbf16> to vector<16x32xbf16>
    %cst = arith.constant dense<0.000000e+00> : vector<16x16xf32>
    %3 = tpu.matmul %2, %1, %cst {dimension_numbers = #tpu.dot_dimension_numbers<[1], [0], [0], [1], [0, 0, 1, 1], [], []>} : vector<16x32xbf16>, vector<32x16xbf16>, vector<16x16xf32> -> vector<16x16xf32>
    %4 = vector.shape_cast %3 : vector<16x16xf32> to vector<2x8x16xf32>
    %cst_4 = arith.constant dense<0xFF800000> : vector<2x16xf32>
    %5 = vector.multi_reduction <maximumf>, %4, %cst_4 [1] : vector<2x8x16xf32> to vector<2x16xf32>
    %6 = vector.shape_cast %5 : vector<2x16xf32> to vector<2x1x16xf32>
    %7 = vector.broadcast %6 : vector<2x1x16xf32> to vector<2x8x16xf32>
    %8 = arith.subf %4, %7 : vector<2x8x16xf32>
    %9 = math.exp %8 : vector<2x8x16xf32>
    %cst_5 = arith.constant dense<0.000000e+00> : vector<2x16xf32>
    %10 = vector.multi_reduction <add>, %9, %cst_5 [1] : vector<2x8x16xf32> to vector<2x16xf32>
    %11 = vector.shape_cast %10 : vector<2x16xf32> to vector<2x1x16xf32>
    %12 = tpu.reciprocal %11 {approx = true} : vector<2x1x16xf32> -> vector<2x1x16xf32>
    %13 = vector.broadcast %12 : vector<2x1x16xf32> to vector<2x8x16xf32>
    %14 = arith.mulf %9, %13 : vector<2x8x16xf32>
    %15 = tpu.transpose %14, [0, 2, 1] : vector<2x8x16xf32> -> vector<2x16x8xf32>
    %16 = arith.truncf %15 : vector<2x16x8xf32> to vector<2x16x8xbf16>
    %c0_6 = arith.constant 0 : index
    %c0_7 = arith.constant 0 : index
    %c0_8 = arith.constant 0 : index
    %17 = vector.load %arg8[%c0_6, %c0_7, %c0_8] : memref<2x16x8xbf16, #tpu.memory_space<vmem>>, vector<2x16x8xbf16>
    tpu.vector_store %arg8[%c0_6, %c0_7, %c0_8], %16 {strides = array<i32>} : memref<2x16x8xbf16, #tpu.memory_space<vmem>>, vector<2x16x8xbf16>,
    %18 = arith.truncf %15 : vector<2x16x8xf32> to vector<2x16x8xbf16>
    "tpu.trace_start"() <{level = 10 : i32, message = "tyn,tnd->tyd"}> : () -> ()
    %cst_9 = arith.constant dense<0.000000e+00> : vector<2x16x32xf32>
    %19 = tpu.matmul %18, %0, %cst_9 {dimension_numbers = #tpu.dot_dimension_numbers<[2], [1], [1], [2], [0, 0, 0, 1, 1, 2], [0], [0]>} : vector<2x16x8xbf16>, vector<2x8x32xbf16>, vector<2x16x32xf32> -> vector<2x16x32xf32>
    "tpu.trace_stop"() : () -> ()
    %20 = arith.truncf %19 : vector<2x16x32xf32> to vector<2x16x32xbf16>
    %c0_10 = arith.constant 0 : index
    %c0_11 = arith.constant 0 : index
    %c0_12 = arith.constant 0 : index
    %21 = vector.load %arg9[%c0_10, %c0_11, %c0_12] : memref<2x16x32xbf16, #tpu.memory_space<vmem>>, vector<2x16x32xbf16>
    tpu.vector_store %arg9[%c0_10, %c0_11, %c0_12], %20 {strides = array<i32>} : memref<2x16x32xbf16, #tpu.memory_space<vmem>>, vector<2x16x32xbf16>,
    %c0_13 = arith.constant 0 : index
    %c0_14 = arith.constant 0 : index
    %22 = vector.load %arg3[%c0_13, %c0_14] : memref<16x32xbf16, #tpu.memory_space<vmem>>, vector<16x32xbf16>
    %23 = arith.extf %22 : vector<16x32xbf16> to vector<16x32xf32>
    %24 = vector.shape_cast %23 : vector<16x32xf32> to vector<1x16x32xf32>
    %25 = vector.broadcast %24 : vector<1x16x32xf32> to vector<2x16x32xf32>
    %26 = arith.mulf %25, %19 : vector<2x16x32xf32>
    %cst_15 = arith.constant dense<0.000000e+00> : vector<2x16xf32>
    %27 = vector.multi_reduction <add>, %26, %cst_15 [2] : vector<2x16x32xf32> to vector<2x16xf32>
    %c0_16 = arith.constant 0 : index
    %c0_17 = arith.constant 0 : index
    %28 = vector.load %arg4[%c0_16, %c0_17] : memref<1x16xf32, #tpu.memory_space<vmem>>, vector<1x16xf32>
    %29 = vector.broadcast %28 : vector<1x16xf32> to vector<2x16xf32>
    %30 = arith.addf %27, %29 : vector<2x16xf32>
    %c0_18 = arith.constant 0 : index
    %c0_19 = arith.constant 0 : index
    %c0_20 = arith.constant 0 : index
    %31 = vector.load %arg6[%c0_18, %c0_19, %c0_20] : memref<2x1x16xf32, #tpu.memory_space<vmem>>, vector<2x1x16xf32>
    %32 = vector.shape_cast %31 : vector<2x1x16xf32> to vector<2x16xf32>
    %cst_21 = arith.constant 0.000000e+00 : f32
    %33 = vector.broadcast %cst_21 : f32 to vector<2x16xf32>
    %34 = arith.maximumf %30, %33 : vector<2x16xf32>
    %35 = arith.mulf %30, %32 : vector<2x16xf32>
    %36 = arith.subf %34, %35 : vector<2x16xf32>
    %37 = math.absf %30 : vector<2x16xf32>
    %cst_22 = arith.constant 0.000000e+00 : f32
    %38 = vector.broadcast %cst_22 : f32 to vector<2x16xf32>
    %39 = arith.subf %38, %37 : vector<2x16xf32>
    %40 = math.exp %39 : vector<2x16xf32>
    %41 = math.log1p %40 : vector<2x16xf32>
    %42 = arith.addf %36, %41 : vector<2x16xf32>
    %43 = vector.shape_cast %30 : vector<2x16xf32> to vector<2x1x16xf32>
    %c0_23 = arith.constant 0 : index
    %c0_24 = arith.constant 0 : index
    %c0_25 = arith.constant 0 : index
    %44 = vector.load %arg7[%c0_23, %c0_24, %c0_25] : memref<2x2x16xf32, #tpu.memory_space<vmem>>, vector<2x1x16xf32>
    tpu.vector_store %arg7[%c0_23, %c0_24, %c0_25], %43 {strides = array<i32>} : memref<2x2x16xf32, #tpu.memory_space<vmem>>, vector<2x1x16xf32>,
    %45 = vector.shape_cast %42 : vector<2x16xf32> to vector<2x1x16xf32>
    %c0_26 = arith.constant 0 : index
    %c1 = arith.constant 1 : index
    %c0_27 = arith.constant 0 : index
    %46 = vector.load %arg7[%c0_26, %c1, %c0_27] : memref<2x2x16xf32, #tpu.memory_space<vmem>>, vector<2x1x16xf32>
    tpu.vector_store %arg7[%c0_26, %c1, %c0_27], %45 {strides = array<i32>} : memref<2x2x16xf32, #tpu.memory_space<vmem>>, vector<2x1x16xf32>,
    return
  }
  func.func @transform_0(%arg0: i32, %arg1: i32) -> (i32, i32) {
    %c0_i32 = arith.constant 0 : i32
    %c0_i32_0 = arith.constant 0 : i32
    return %c0_i32, %arg1 : i32, i32
  }
  func.func @transform_1(%arg0: i32, %arg1: i32) -> (i32, i32) {
    %c0_i32 = arith.constant 0 : i32
    %c0_i32_0 = arith.constant 0 : i32
    return %arg1, %c0_i32 : i32, i32
  }
  func.func @transform_2(%arg0: i32, %arg1: i32) -> (i32, i32) {
    %c0_i32 = arith.constant 0 : i32
    %c0_i32_0 = arith.constant 0 : i32
    return %c0_i32, %arg1 : i32, i32
  }
  func.func @transform_3(%arg0: i32, %arg1: i32) -> (i32, i32, i32) {
    %c0_i32 = arith.constant 0 : i32
    %c0_i32_0 = arith.constant 0 : i32
    %c0_i32_1 = arith.constant 0 : i32
    return %arg0, %c0_i32, %c0_i32_0 : i32, i32, i32
  }
  func.func @transform_4(%arg0: i32, %arg1: i32) -> (i32, i32, i32) {
    %c0_i32 = arith.constant 0 : i32
    %c0_i32_0 = arith.constant 0 : i32
    return %arg0, %c0_i32, %arg1 : i32, i32, i32
  }
  func.func @transform_5(%arg0: i32, %arg1: i32) -> (i32, i32, i32) {
    %c0_i32 = arith.constant 0 : i32
    %c0_i32_0 = arith.constant 0 : i32
    return %arg0, %c0_i32, %arg1 : i32, i32, i32
  }
  func.func @transform_6(%arg0: i32, %arg1: i32) -> (i32, i32, i32) {
    %c0_i32 = arith.constant 0 : i32
    %c0_i32_0 = arith.constant 0 : i32
    return %arg0, %arg1, %c0_i32 : i32, i32, i32
  }
  func.func @transform_7(%arg0: i32, %arg1: i32) -> (i32, i32, i32) {
    %c0_i32 = arith.constant 0 : i32
    %c0_i32_0 = arith.constant 0 : i32
    return %arg0, %arg1, %c0_i32 : i32, i32, i32
  }
}

</mosaic_0001>

<bundles_post_ra>
// kernel: tpu_custom_call.1
= control target key start
LH: loop header
LB: loop body
LE: loop exit
PB: predicated region body
PF: predicated region fallthrough
CT: control target
= control target key end

     0   :  { %s2001_s0 = inlined_call_operand.vmem [shape: bf16[32,16], index: 0, kind: input, shape index: {}]   ;;  %s2002_s1 = inlined_call_operand.hbm [shape: bf16[16,32], index: 1, kind: input, shape index: {}]   ;;  %s2003_s2 = inlined_call_operand.vmem [shape: f32[1,16], index: 2, kind: input, shape index: {}]   ;;  %s2004_s3 = inlined_call_operand.vmem [shape: bf16[8,8,32], index: 3, kind: input, shape index: {}]   ;;  %s2005_s4 = inlined_call_operand.hbm [shape: f32[8,1,16], index: 4, kind: input, shape index: {}]   ;;  %s2006_s5 = inlined_call_operand.hbm [shape: f32[8,2,16], index: 5, kind: output, shape index: {0}]   ;;  %s2007_s6 = inlined_call_operand.vmem [shape: bf16[8,16,8], index: 6, kind: output, shape index: {1}]   ;;  %s2008_s7 = inlined_call_operand.hbm [shape: bf16[8,16,32], index: 7, kind: output, shape index: {2}]  }
   0x1   :  { %2013 = sst [smem:[#allocation14_spill]] %s2002_s1 }
   0x2   :  { %13 = vsyncpa [#allocation3], 0 }
   0x3   :  { %14 = vsyncpa [#allocation6], 0 }
   0x4   :  { %16 = vsyncpa [#allocation6 + $0x1], 0 }
   0x5   :  { %17 = vsyncpa [#allocation4], 0 }
   0x6   :  { %19 = vsyncpa [#allocation4 + $0x1], 0 }
   0x7   :  { %20 = vsyncpa [#allocation9], 0 }
   0x8   :  { %22 = vsyncpa [#allocation9 + $0x1], 0  ;;  %s1668_s24 = smov 0   ;;  %s1670_s25 = smov 0  }
   0x9   :  { %s1672_s26 = smov 0   ;;  %s1674_s27 = smov 0  }
   0xa   :  { %s1676_s28 = smov 0   ;;  %s1678_s29 = smov 0  }
   0xb LB: > { %s1227_s30 = sadd.s32 4294967295, %s1611_s29   ;;  %s1228_s8 = sadd.s32 4294967294, %s1611_s29   ;;  %s1611_s29 = sphi %s1678_s29, %s28_s29   ;;  %s1607_s28 = sphi %s1676_s28, %s2033_s28   ;;  %s1603_s27 = sphi %s1674_s27, %s2032_s27   ;;  %s1599_s26 = sphi %s1672_s26, %s2031_s26   ;;  %s1595_s25 = sphi %s1670_s25, %s2030_s25   ;;  %s1591_s24 = sphi %s1668_s24, %s2029_s24  }
   0xc   : > { %p166_p0 = scmp.ne.s32.totalorder %s1595_s25, %s1591_s24  ;;  %p1702_p1 = scmp.eq.s32.totalorder %s1227_s30, 0 }
   0xd   : > { %p1706_p2 = scmp.eq.s32.totalorder %s1227_s30, 3  ;;  %p198_p3 = scmp.eq.s32.totalorder %s1228_s8, 3 }
   0xe   : > { %s2014_s9 = scalar_select %p1702_p1, 1, 0 }
   0xf   : > { %s2015_s10 = scalar_select %p1706_p2, 1, 0 }
  0x10   : > { %p1712_p4 = por %p1702_p1, %p166_p0  ;;  %p1229_p5 = scmp.ge.s32.totalorder %s1611_s29, 1 }
  0x11   : > { %p1717_p6 = por %p198_p3, %p166_p0  ;;  %p261_p7 = scmp.lt.s32.totalorder %s1611_s29, 5 }
  0x12   : > { %s2016_s11 = scalar_select %p1712_p4, 1, 0 }
  0x13   : > { %s2017_s12 = scalar_select %p1717_p6, 1, 0 }
  0x14   : > { %p1722_p8 = pnand %p1229_p5, %p261_p7  ;;  %s1613_s14 = smov [#allocation2]  }
  0x15   : > { %s283_s15 = sshll.u32 %s1613_s14, 4  ;;  %s40_s17 = sadd.s32 1, %s1607_s28  ;;  %s284_s15 = int_to_ptr.vmem [resolvable:$true] %s283_s15 }
  0x16   : > { %s2018_s13 = scalar_select %p1722_p8, 1, 0 }
  0x17   : > { %p1327_p9 = pneg %p1722_p8  ;;  %s2020_s1 = sld [smem:[#allocation14_spill]] }
  0x19   : > { %p1730_p10 = pnand %p1327_p9, %p1702_p1 }
  0x1b   : > { %p1437_p12 = pneg %p1730_p10 }
  0x1d   : > { %s1435_s20 = scalar_lea.hbm %s2020_s1, 128 }
  0x1e   : > { %p1436_p11 = scmp.ne.s32.totalorder %s2020_s1, %s1435_s20  ;;  %p1442_p3 = scmp.lt.u32.totalorder %s1435_s20, %s2020_s1 }
  0x20   : > { %p1438_p13 = pnand %p1437_p12, %p1436_p11 }
  0x22   : > { %p1439_p0 = pneg %p1438_p13 }
  0x24   : > { %p1444_p5 = pnand %p1442_p3, %p1439_p0 }
  0x26   : > { %1447 = shalt.err (!%p1444_p5)
}
  0x27   : > { %s1448_s8 = scalar_lea.vmem %s284_s15, 128  ;;  %p1456_p4 = scmp.lt.s32.totalorder %s284_s15, %s284_s15 }
  0x28   : > { %p1449_p7 = scmp.ne.s32.totalorder %s284_s15, %s1448_s8  ;;  %p1457_p1 = scmp.lt.s32.totalorder %s1448_s8, %s1448_s8 }
  0x2a   : > { %p1451_p9 = pnand %p1449_p7, %p1437_p12  ;;  %p1458_p8 = por %p1457_p1, %p1456_p4 }
  0x2c   : > { %p1452_p6 = pneg %p1451_p9 }
  0x2e   : > { %p1459_p2 = pnand %p1458_p8, %p1452_p6 }
  0x30   : > { %1462 = shalt.err (!%p1459_p2)
}
  0x31   : > { %s1614_s14 = smov 64   ;;  %s1615_s18 = smov 4  }
  0x32   : > { %1330 = dma.hbm_to_vmem [thread:$0]  (!%p1730_p10), %s2020_s1, 128, %s284_s15, [#allocation3], %s1614_s14, %s1614_s14, %s1615_s18  }
  0x33   : > { %p42_p1 = scmp.ge.s32.totalorder %s40_s17, 4  ;;  %s153_s21 = sadd.s32 1, %s1599_s26 }
  0x34   : > { %p160_p2 = scmp.ne.s32.totalorder %s1599_s26, %s1595_s25  ;;  %p161_p4 = scmp.eq.s32.totalorder %s1611_s29, 0 }
  0x35   : > { %s2035_s17 = smov (%p42_p1, %s40_s17), 0  ;;  %p2022_p8 = scmp.ne.s32.totalorder %s2015_s10, 0 }
  0x36   : > { %p1757_p6 = por %p161_p4, %p160_p2  ;;  %s148_s16 = ssub.s32 %s1607_s28, %s2035_s17 }
  0x37   : > { %p1763_p11 = por %p2022_p8, %p160_p2  ;;  %p1343_p12 = scmp.lt.s32.totalorder %s1611_s29, 4 }
  0x38   : > { %p151_p10 = scmp.eq.s32.totalorder %s148_s16, 0  ;;  %s312_s15 = sand.u32 1, %s1599_s26  }
  0x39   : > { %s1234_s30 = sshll.u32 %s312_s15, 1  ;;  %s1273_s14 = sshll.u32 %s1607_s28, 5 }
  0x3a   : > { %s1772_s8 = scalar_select %p151_p10, %s1599_s26, %s153_s21  }
  0x3b   : > { %s1778_s20 = scalar_lea.hbm %s2005_s4, %s1273_s14  ;;  %s316_s10 = scalar_lea.vmem [#allocation5], %s1234_s30 }
  0x3c   : > { %s324_s1 = sshll.u32 %s316_s10, 4  ;;  %p1784_p13 = pnand %p1343_p12, %p1757_p6  ;;  %s1780_s1 = int_to_ptr.vmem [resolvable:$true] %s324_s1 }
  0x3d   : > { %s1788_s21 = scalar_lea.sflag [#allocation6], %s312_s15  ;;  %s1463_s18 = scalar_lea.hbm %s1778_s20, 32 }
  0x3e   : > { %p1464_p0 = scmp.ne.s32.totalorder %s1778_s20, %s1463_s18  ;;  %p1465_p3 = pneg %p1784_p13 }
  0x3f   : > { %s1468_s22 = scalar_lea.hbm %s2005_s4, 128  ;;  %p1469_p9 = scmp.lt.u32.totalorder %s1778_s20, %s2005_s4 }
  0x40   : > { %p1466_p5 = pnand %p1465_p3, %p1464_p0  ;;  %p1470_p1 = scmp.lt.u32.totalorder %s1468_s22, %s1463_s18 }
  0x41   : > { %p1472_p4 = scmp.lt.u32.totalorder %s1463_s18, %s1778_s20 }
  0x42   : > { %p1467_p7 = pneg %p1466_p5  ;;  %p1471_p2 = por %p1470_p1, %p1469_p9 }
  0x44   : > { %p1473_p6 = por %p1472_p4, %p1471_p2 }
  0x46   : > { %p1474_p8 = pnand %p1473_p6, %p1467_p7 }
  0x48   : > { %1477 = shalt.err (!%p1474_p8)
}
  0x49   : > { %s1478_s15 = scalar_lea.vmem %s1780_s1, 32  ;;  %s1616_s30 = smov [#allocation5]  }
  0x4a   : > { %p1479_p12 = scmp.ne.s32.totalorder %s1780_s1, %s1478_s15  ;;  %s1483_s14 = sshll.u32 %s1616_s30, 4  ;;  %s1484_s14 = int_to_ptr.vmem [resolvable:$false] %s1483_s14 }
  0x4b   : > { %s1485_s19 = scalar_lea.vmem %s1484_s14, 64  ;;  %p1486_p5 = scmp.lt.s32.totalorder %s1780_s1, %s1484_s14 }
  0x4c   : > { %p1481_p10 = pnand %p1479_p12, %p1465_p3  ;;  %p1487_p9 = scmp.lt.s32.totalorder %s1485_s19, %s1478_s15 }
  0x4e   : > { %p1482_p0 = pneg %p1481_p10  ;;  %p1488_p1 = por %p1487_p9, %p1486_p5 }
  0x50   : > { %p1489_p2 = pnand %p1488_p1, %p1482_p0 }
  0x52   : > { %1492 = shalt.err (!%p1489_p2)
}
  0x53   : > { %s1617_s18 = smov 16   ;;  %s1618_s22 = smov 1  }
  0x54   : > { %1334 = dma.hbm_to_vmem [thread:$0]  (!%p1784_p13), %s1778_s20, 32, %s1780_s1, %s1788_s21, %s1617_s18, %s1617_s18, %s1618_s22  }
  0x55   : > { %p2025_p3 = scmp.ne.s32.totalorder %s2018_s13, 0 }
  0x56   : > { %p2026_p7 = scmp.ne.s32.totalorder (!%p2025_p3), %s2014_s9, 0 }
  0x57   : > { %336 = sbr.rel (%p2025_p3) target bundleno = 1074 (0x432), region = 40 }
  0x5e   : > { %1574 = dma.done.wait (%p2026_p7), [#allocation3], 128  }
  0x5f   : > { %1576 = vsyncadd (%p2026_p7), [#allocation3], 4294967168  ;;  %s1823_s10 = sand.u32 1, %s1595_s25   ;;  %p2027_p13 = scmp.ne.s32.totalorder %s2016_s11, 0 }
  0x60   : > { %s1239_s15 = sshll.u32 %s1823_s10, 1  ;;  %s343_s30 = scalar_lea.sflag [#allocation6], %s1823_s10 }
  0x61   : > { %s1827_s14 = scalar_lea.vmem [#allocation5], %s1239_s15 }
  0x62   : > { %1578 = dma.done.wait (%p2027_p13), %s343_s30, 32  }
  0x63   : > { %1580 = vsyncadd (%p2027_p13), %s343_s30, 4294967264  ;;  %s1242_s1 = sshll.u32 %s1603_s27, 1  ;;  %v1619_v0 = vmov 0.0   ;;  %vm1620_vm0 = vmmov 0   ;;  %v1408_v1 = vld [vmem:[%s2001_s0] sm:$0xff]   ;;  %v1409_v2 = vld [vmem:[%s2001_s0 + $0x8] sm:$0xff]  }
  0x64   : > { %1297 = vmatprep.subr.bf16.mxu0 %v1619_v0  ;;  %1301 = vmatprep.mubr.msk.bf16.mxu0 %vm1620_vm0, %v1619_v0  ;;  %p413_p4 = scmp.lt.s32.totalorder %s1242_s1, 7  ;;  %vm458_vm1 = vcmask 261120   ;;  %vm503_vm2 = vcmask 130048   ;;  %vm631_vm3 = vcmask 1043456   ;;  %vm622_vm4 = vcmask 60416   ;;  %v1287_v60 = vld [vmem:[#allocation2] sm:$0xff]  }
  0x65   : > { %1305 = vmatprep.subr.bf16.mxu1 %v1619_v0  ;;  %1307 = vmatprep.mubr.msk.bf16.mxu1 %vm1620_vm0, %v1619_v0  ;;  %vm627_vm5 = vcmask 64512   ;;  %v1288_v61 = vunpack.c.l.bf16 %v1287_v60  ;;  %v1289_v62 = vunpack.c.h.bf16 %v1287_v60  ;;  %vm739_vm6 = vcmask 257024   ;;  %s1285_s16 = sshll.u32 %s1603_s27, 8  ;;  %s1622_s30 = smov [#allocation8]  }
  0x66   : > { %s2037_s1 = smov (!%p413_p4, %s1242_s1), 7  ;;  %1298 = vmatpush3.bf16.msra.mxu0 %v1408_v1  ;;  %s1912_s18 = scalar_lea.hbm %s2008_s7, %s1285_s16 }
  0x67   : > { %s1243_s9 = sshll.u32 %s2037_s1, 2  ;;  %1299 = vmatprep.subr.bf16.mxu0 %v1619_v0  ;;  %s1274_s22 = sshll.u32 %s2037_s1, 3 }
  0x68   : > { %s416_s20 = scalar_lea.vmem %s2004_s3, %s1243_s9  ;;  %s429_s9 = scalar_lea.vmem %s2007_s6, %s1274_s22 }
  0x69   : > { %v435_v3 = vld [vmem:[%s416_s20] sm:$0xf]  ;;  %v1852_v4 = vld [vmem:[%s416_s20 + $0x4] sm:$0xf]  ;;  %s1241_s1 = sshll.u32 %s1823_s10, 4  ;;  %s978_s22 = scalar_lea.sflag [#allocation9], %s1823_s10 }
  0x6a   : > { %v1247_v5 = vcombine.low %v435_v3, %v1852_v4  ;;  %1300 = vmatpush3.bf16.msra.mxu0 %v1409_v2  ;;  %v633_v48 = vsel %vm631_vm3, %v435_v3, 0  ;;  %v680_v52 = vsel %vm631_vm3, %v1852_v4, 0  ;;  %s1874_s11 = scalar_lea.vmem [#allocation8], %s1241_s1 }
  0x6b   : > { %1306 = vmatpush3.bf16.msra.mxu1 %v633_v48 }
  0x6c   : > { %1311 = vmatprep.subr.bf16.mxu1 %v1619_v0 }
  0x6d   : > { %1302 = vmatmul.mubr.msk.bf16.vlgmr.msra.gmra.mrb[0].mxu0 %vm458_vm1, %v1247_v5 }
 0x140   : > { %v496_v6 = vpop.f32.mrb[0].mxu0 }
 0x141   : > { %v504_v7 = vsel %vm503_vm2, %v496_v6, -inf  ;;  %v1303_v8 = vpop.f32.mrb[1].mxu0 }
 0x142   : > { %v505_v9 = vrot.slane %v504_v7, 4  ;;  %v499_v10 = vpop.f32.mrb[2].mxu0 }
 0x143   : > { %v511_v11 = vsel %vm503_vm2, %v499_v10, -inf  ;;  %v1304_v12 = vpop.f32.mrb[3].mxu0 }
 0x144   : > { %v506_v13 = vmax.f32 %v504_v7, %v505_v9  ;;  %v512_v14 = vrot.slane %v511_v11, 4 }
 0x146   : > { %v507_v15 = vrot.slane %v506_v13, 2  ;;  %v513_v16 = vmax.f32 %v511_v11, %v512_v14 }
 0x148   : > { %v508_v17 = vmax.f32 %v506_v13, %v507_v15  ;;  %v514_v18 = vrot.slane %v513_v16, 2 }
 0x14a   : > { %v509_v19 = vrot.slane %v508_v17, 1  ;;  %v515_v20 = vmax.f32 %v513_v16, %v514_v18 }
 0x14c   : > { %v510_v21 = vmax.f32 %v508_v17, %v509_v19  ;;  %v516_v22 = vrot.slane %v515_v20, 1  ;;  %v1261_v19 = vld [vmem:[%s2003_s2] ss:$0 sm:$0xff] }
 0x14e   : > { %v518_v23 = vsub.f32 %v496_v6, %v510_v21  ;;  %v517_v24 = vmax.f32 %v515_v20, %v516_v22  ;;  %v1621_v20 = vmov 0   ;;  %v1262_v21 = vld [vmem:[%s1827_s14] ss:$0 sm:$0xff]  ;;  %v1263_v22 = vld [vmem:[%s1827_s14 + $0x1] ss:$0 sm:$0xff]  ;;  %s1016_s14 = sshll.u32 %s1874_s11, 4  ;;  %s1906_s14 = int_to_ptr.vmem [resolvable:$true] %s1016_s14 }
 0x14f   : > { %1406 = vset.pattern.permute.xlu1 %v1621_v20  ;;  %s1493_s15 = scalar_lea.vmem %s1906_s14, 256 }
 0x150   : > { %v520_v25 = vmul.f32 1.442695, %v518_v23  ;;  %v519_v26 = vsub.f32 %v499_v10, %v517_v24  ;;  %p1494_p6 = scmp.ne.s32.totalorder %s1906_s14, %s1493_s15 }
 0x152   : > { %1411 = vpow2.f32 %v520_v25  ;;  %v522_v27 = vmul.f32 1.442695, %v519_v26  ;;  %p1495_p8 = pnand %p1494_p6, %p1763_p11 }
 0x154   : > { %1413 = vpow2.f32 %v522_v27  ;;  %p1496_p12 = pneg %p1495_p8 }
 0x15c   : > { %v1412_v28 = vpop.eup %1411 }
 0x15d   : > { %v524_v29 = vsel %vm503_vm2, %v1412_v28, 0.0 }
 0x15e   : > { %v1414_v30 = vpop.eup %1413  ;;  %v525_v31 = vrot.slane %v524_v29, 4 }
 0x15f   : > { %v531_v32 = vsel %vm503_vm2, %v1414_v30, 0.0 }
 0x160   : > { %v526_v33 = vadd.f32 %v525_v31, %v524_v29  ;;  %v532_v34 = vrot.slane %v531_v32, 4 }
 0x162   : > { %v527_v35 = vrot.slane %v526_v33, 2  ;;  %v533_v36 = vadd.f32 %v532_v34, %v531_v32 }
 0x164   : > { %v528_v37 = vadd.f32 %v527_v35, %v526_v33  ;;  %v534_v38 = vrot.slane %v533_v36, 2 }
 0x166   : > { %v529_v39 = vrot.slane %v528_v37, 1  ;;  %v535_v40 = vadd.f32 %v534_v38, %v533_v36 }
 0x168   : > { %v530_v41 = vadd.f32 %v529_v39, %v528_v37  ;;  %v536_v42 = vrot.slane %v535_v40, 1 }
 0x16a   : > { %1415 = vrcp.f32 %v530_v41  ;;  %v537_v43 = vadd.f32 %v536_v42, %v535_v40 }
 0x16c   : > { %1417 = vrcp.f32 %v537_v43 }
 0x174   : > { %v1416_v44 = vpop.eup %1415 }
 0x175   : > { %v540_v45 = vmul.f32 %v1416_v44, %v1412_v28 }
 0x176   : > { %v1418_v46 = vpop.eup %1417 }
 0x177   : > { %542 = vxpose.xlu0.b32.start.end [1/1] (short) (narrow) %v540_v45, 16  ;;  %v541_v47 = vmul.f32 %v1418_v46, %v1414_v30 }
 0x17c   : > { %574 = vxpose.xlu0.b32.start.end [1/1] (short) (narrow) %v541_v47, 16 }
 0x1a5   : > { %1407 = vset.pattern.permute.xlu0 %v1621_v20 }
 0x1f7   : > { %v558_v49 = vpop.trf.xlu0 }
 0x1f8   : > { %v1275_v50 = vpack.c.bf16 %v558_v49, %v558_v49 }
 0x1fa   : > { %623 = vst.msk [vmem:[%s429_s9] sm:$0xf] %vm622_vm4, %v1275_v50 }
 0x1fb   : > { %v559_v51 = vpop.trf.xlu0 }
 0x1fc   : > { %v606_v53 = vpack.c.bf16 %v559_v51, %v558_v49  ;;  %v1276_v54 = vpack.c.bf16 %v559_v51, %v559_v51 }
 0x1fe   : > { %624 = vst.msk [vmem:[%s429_s9 + $0x4] sm:$0xf] %vm622_vm4, %v1276_v54  ;;  %1308 = vmatmul.mubr.msk.bf16.vlgmr.msra.gmra.mrb[0].mxu1 %vm627_vm5, %v606_v53 }
 0x1ff   : > { %1312 = vmatpush3.bf16.msra.mxu1 %v680_v52  ;;  %v590_v55 = vpop.trf.xlu0  ;;  %1313 = vmatprep.mubr.msk.bf16.mxu1 %vm1620_vm0, %v1619_v0 }
 0x200   : > { %v1277_v56 = vpack.c.bf16 %v590_v55, %v590_v55 }
 0x202   : > { %625 = vst.msk [vmem:[%s429_s9 + $0x8] sm:$0xf] %vm622_vm4, %v1277_v56 }
 0x203   : > { %v591_v57 = vpop.trf.xlu0 }
 0x204   : > { %v607_v58 = vpack.c.bf16 %v591_v57, %v590_v55  ;;  %v1278_v59 = vpack.c.bf16 %v591_v57, %v591_v57 }
 0x206   : > { %626 = vst.msk [vmem:[%s429_s9 + $0xc] sm:$0xf] %vm622_vm4, %v1278_v59  ;;  %1314 = vmatmul.mubr.msk.bf16.vlgmr.msra.gmra.mrb[4].mxu1 %vm627_vm5, %v607_v58  ;;  %s1497_s9 = sshll.u32 %s1622_s30, 4  ;;  %s1498_s9 = int_to_ptr.vmem [resolvable:$false] %s1497_s9 }
 0x207   : > { %s1499_s1 = scalar_lea.vmem %s1498_s9, 512  ;;  %p1500_p10 = scmp.lt.s32.totalorder %s1906_s14, %s1498_s9 }
 0x208   : > { %p1501_p0 = scmp.lt.s32.totalorder %s1499_s1, %s1493_s15 }
 0x20a   : > { %p1502_p5 = por %p1501_p0, %p1500_p10 }
 0x20c   : > { %p1503_p9 = pnand %p1502_p5, %p1496_p12 }
 0x2d1   : > { %v669_v63 = vpop.f32.mrb[0].mxu1 }
 0x2d2   : > { %v1279_v1 = vpack.c.bf16 %v669_v63, %v669_v63  ;;  %v1309_v2 = vpop.f32.mrb[1].mxu1  ;;  %v748_v3 = vmul.f32 %v1288_v61, %v669_v63 }
 0x2d3   : > { %v672_v4 = vpop.f32.mrb[2].mxu1 }
 0x2d4   : > { %740 = vst.msk [vmem:[%s1874_s11] sm:$0xf] %vm739_vm6, %v1279_v1  ;;  %v1280_v0 = vpack.c.bf16 %v672_v4, %v672_v4  ;;  %v749_v5 = vmul.f32 %v1289_v62, %v672_v4  ;;  %v1310_v6 = vpop.f32.mrb[3].mxu1  ;;  %v752_v7 = vsel %vm458_vm1, %v748_v3, 0.0 }
 0x2d5   : > { %753 = vadd.xlane.f32.xlu1 %v752_v7 }
 0x2d6   : > { %741 = vst.msk [vmem:[%s1874_s11 + $0x4] sm:$0xf] %vm739_vm6, %v1280_v0  ;;  %v755_v8 = vsel %vm458_vm1, %v749_v5, 0.0 }
 0x2d9   : > { %756 = vadd.xlane.f32.xlu1 %v755_v8  ;;  %v716_v9 = vpop.f32.mrb[4].mxu1 }
 0x2da   : > { %v1281_v10 = vpack.c.bf16 %v716_v9, %v716_v9  ;;  %v750_v11 = vmul.f32 %v1288_v61, %v716_v9  ;;  %v1315_v12 = vpop.f32.mrb[5].mxu1 }
 0x2db   : > { %v719_v13 = vpop.f32.mrb[6].mxu1 }
 0x2dc   : > { %742 = vst.msk [vmem:[%s1874_s11 + $0x8] sm:$0xf] %vm739_vm6, %v1281_v10  ;;  %v1282_v14 = vpack.c.bf16 %v719_v13, %v719_v13  ;;  %v751_v15 = vmul.f32 %v1289_v62, %v719_v13  ;;  %v1316_v16 = vpop.f32.mrb[7].mxu1  ;;  %v758_v17 = vsel %vm458_vm1, %v750_v11, 0.0 }
 0x2dd   : > { %759 = vadd.xlane.f32.xlu1 %v758_v17 }
 0x2de   : > { %743 = vst.msk [vmem:[%s1874_s11 + $0xc] sm:$0xf] %vm739_vm6, %v1282_v14  ;;  %v761_v18 = vsel %vm458_vm1, %v751_v15, 0.0 }
 0x2df   : > { %762 = vadd.xlane.f32.xlu0 %v761_v18 }
 0x2ee   : > { %771 = vbcast.lane.b32.xlu1 %v1261_v19, 256 }
 0x2f2   : > { %775 = vbcast.lane.b32.xlu1 %v1261_v19, 264 }
 0x2f6   : > { %800 = vbcast.lane.b32.xlu1 %v1262_v21, 256 }
 0x2fa   : > { %804 = vbcast.lane.b32.xlu1 %v1262_v21, 264 }
 0x2fe   : > { %807 = vbcast.lane.b32.xlu1 %v1263_v22, 256 }
 0x302   : > { %811 = vbcast.lane.b32.xlu1 %v1263_v22, 264 }
 0x362   : > { %v754_v23 = vpop.xlane.xlu1 %753 }
 0x366   : > { %v757_v24 = vpop.xlane.xlu1 %756 }
 0x36a   : > { %v760_v25 = vpop.xlane.xlu1 %759 }
 0x36c   : > { %v763_v31 = vpop.xlane.xlu0 %762 }
 0x36e   : > { %v772_v26 = vpop.permute.xlu1 %771 }
 0x36f   : > { %v779_v27 = vadd.f32 %v772_v26, %v754_v23  ;;  %v1893_v28 = vadd.f32 %v772_v26, %v760_v25 }
 0x371   : > { %v825_v29 = vand.u32 2147483647, %v779_v27  ;;  %v827_v30 = vand.u32 2147483647, %v1893_v28  ;;  %886 = vperm.xlu1 %1406, %v779_v27   ;;  %v785_v62 = vmax.f32 %v779_v27, 0.0 }
 0x372   : > { %v776_v32 = vpop.permute.xlu1 %775 }
 0x373   : > { %v829_v33 = vsub.f32 0.0, %v825_v29  ;;  %v831_v34 = vsub.f32 0.0, %v827_v30  ;;  %v780_v35 = vadd.f32 %v776_v32, %v757_v24  ;;  %v1896_v36 = vadd.f32 %v776_v32, %v763_v31 }
 0x374   : > { %v787_v24 = vmax.f32 %v1893_v28, 0.0 }
 0x375   : > { %v833_v37 = vmul.f32 1.442695, %v829_v33  ;;  %v837_v38 = vmul.f32 1.442695, %v831_v34  ;;  %v826_v39 = vand.u32 2147483647, %v780_v35  ;;  %889 = vperm.xlu1 %1406, %v780_v35   ;;  %895 = vperm.xlu0 %1407, %v1896_v36  }
 0x376   : > { %v828_v40 = vand.u32 2147483647, %v1896_v36  ;;  %v801_v48 = vpop.permute.xlu1 %800  ;;  %v786_v11 = vmax.f32 %v780_v35, 0.0  ;;  %v788_v33 = vmax.f32 %v1896_v36, 0.0 }
 0x377   : > { %1419 = vpow2.f32 %v833_v37  ;;  %v830_v41 = vsub.f32 0.0, %v826_v39  ;;  %v817_v58 = vmul.f32 %v801_v48, %v779_v27 }
 0x378   : > { %1421 = vpow2.f32 %v837_v38  ;;  %v832_v42 = vsub.f32 0.0, %v828_v40 }
 0x379   : > { %v835_v43 = vmul.f32 1.442695, %v830_v41  ;;  %892 = vperm.xlu1 %1406, %v1893_v28   ;;  %v821_v0 = vsub.f32 %v785_v62, %v817_v58 }
 0x37a   : > { %v839_v44 = vmul.f32 1.442695, %v832_v42  ;;  %v805_v55 = vpop.permute.xlu1 %804 }
 0x37b   : > { %1423 = vpow2.f32 %v835_v43  ;;  %v818_v5 = vmul.f32 %v805_v55, %v780_v35 }
 0x37c   : > { %1425 = vpow2.f32 %v839_v44 }
 0x37d   : > { %v822_v18 = vsub.f32 %v786_v11, %v818_v5 }
 0x37e   : > { %v808_v63 = vpop.permute.xlu1 %807 }
 0x37f   : > { %v819_v19 = vmul.f32 %v808_v63, %v1893_v28 }
 0x381   : > { %v1420_v45 = vpop.eup %1419  ;;  %v823_v30 = vsub.f32 %v787_v24, %v819_v19 }
 0x382   : > { %v1422_v46 = vpop.eup %1421  ;;  %v841_v47 = vadd.f32 1.0, %v1420_v45  ;;  %v844_v53 = vmul.f32 -0.5, %v1420_v45  ;;  %v847_v59 = vand.u32 2147483647, %v1420_v45  ;;  %v812_v20 = vpop.permute.xlu1 %811 }
 0x383   : > { %v859_v49 = vadd.f32 1.0, %v1422_v46  ;;  %v862_v60 = vmul.f32 -0.5, %v1422_v46  ;;  %v865_v13 = vand.u32 2147483647, %v1422_v46  ;;  %v820_v31 = vmul.f32 %v812_v20, %v1896_v36 }
 0x384   : > { %1427 = vlog2.f32 %v841_v47  ;;  %v845_v56 = vadd.f32 1.0, %v844_v53  ;;  %vm848_vm7 = vcmp.lt.f32.partialorder %v847_v59, 0.0004427343 }
 0x385   : > { %v1424_v50 = vpop.eup %1423  ;;  %1429 = vlog2.f32 %v859_v49  ;;  %v863_v8 = vadd.f32 1.0, %v862_v60  ;;  %vm866_vm9 = vcmp.lt.f32.partialorder %v865_v13, 0.0004427343  ;;  %v824_v28 = vsub.f32 %v788_v33, %v820_v31 }
 0x386   : > { %v1426_v51 = vpop.eup %1425  ;;  %v850_v52 = vadd.f32 1.0, %v1424_v50  ;;  %v853_v57 = vmul.f32 -0.5, %v1424_v50  ;;  %v846_v2 = vmul.f32 %v1420_v45, %v845_v56  ;;  %v856_v6 = vand.u32 2147483647, %v1424_v50 }
 0x387   : > { %v868_v54 = vadd.f32 1.0, %v1426_v51  ;;  %v871_v9 = vmul.f32 -0.5, %v1426_v51  ;;  %v864_v22 = vmul.f32 %v1422_v46, %v863_v8  ;;  %v874_v26 = vand.u32 2147483647, %v1426_v51 }
 0x388   : > { %1431 = vlog2.f32 %v850_v52  ;;  %v854_v3 = vadd.f32 1.0, %v853_v57  ;;  %vm857_vm8 = vcmp.lt.f32.partialorder %v856_v6, 0.0004427343 }
 0x389   : > { %1433 = vlog2.f32 %v868_v54  ;;  %v872_v23 = vadd.f32 1.0, %v871_v9  ;;  %vm875_vm10 = vcmp.lt.f32.partialorder %v874_v26, 0.0004427343 }
 0x38a   : > { %v855_v15 = vmul.f32 %v1424_v50, %v854_v3 }
 0x38b   : > { %v873_v32 = vmul.f32 %v1426_v51, %v872_v23 }
 0x38e   : > { %v1428_v61 = vpop.eup %1427 }
 0x38f   : > { %v843_v1 = vmul.f32 0.6931472, %v1428_v61  ;;  %v1430_v4 = vpop.eup %1429 }
 0x390   : > { %v861_v16 = vmul.f32 0.6931472, %v1430_v4 }
 0x391   : > { %v849_v7 = vsel %vm848_vm7, %v846_v2, %v843_v1 }
 0x392   : > { %v1432_v10 = vpop.eup %1431  ;;  %v877_v12 = vadd.f32 %v849_v7, %v821_v0  ;;  %v867_v27 = vsel %vm866_vm9, %v864_v22, %v861_v16 }
 0x393   : > { %v852_v14 = vmul.f32 0.6931472, %v1432_v10  ;;  %v1434_v17 = vpop.eup %1433  ;;  %v879_v34 = vadd.f32 %v867_v27, %v823_v30 }
 0x394   : > { %929 = vperm.xlu1 %1406, %v877_v12   ;;  %v870_v29 = vmul.f32 0.6931472, %v1434_v17 }
 0x395   : > { %v858_v21 = vsel %vm857_vm8, %v855_v15, %v852_v14 }
 0x396   : > { %v878_v25 = vadd.f32 %v858_v21, %v822_v18  ;;  %v876_v35 = vsel %vm875_vm10, %v873_v32, %v870_v29 }
 0x397   : > { %v880_v37 = vadd.f32 %v876_v35, %v824_v28 }
 0x398   : > { %932 = vperm.xlu1 %1406, %v878_v25  }
 0x39c   : > { %935 = vperm.xlu1 %1406, %v879_v34  }
 0x3a0   : > { %938 = vperm.xlu1 %1406, %v880_v37  }
 0x3a1   : > { %1506 = shalt.err (!%p1503_p9)
}
 0x3a2   : > { %s1507_s11 = scalar_lea.hbm %s1912_s18, 256  ;;  %s1511_s16 = scalar_lea.hbm %s2008_s7, 1024 }
 0x3a3   : > { %p1508_p1 = scmp.ne.s32.totalorder %s1912_s18, %s1507_s11  ;;  %p1512_p7 = scmp.lt.u32.totalorder %s1912_s18, %s2008_s7 }
 0x3a4   : > { %p1513_p13 = scmp.lt.u32.totalorder %s1511_s16, %s1507_s11  ;;  %p1515_p6 = scmp.lt.u32.totalorder %s1507_s11, %s1912_s18 }
 0x3a5   : > { %p1509_p2 = pnand %p1508_p1, %p1763_p11 }
 0x3a6   : > { %p1514_p4 = por %p1513_p13, %p1512_p7 }
 0x3a7   : > { %p1510_p3 = pneg %p1509_p2 }
 0x3a8   : > { %p1516_p8 = por %p1515_p6, %p1514_p4 }
 0x3aa   : > { %p1517_p12 = pnand %p1516_p8, %p1510_p3 }
 0x3ac   : > { %1520 = shalt.err (!%p1517_p12)
}
 0x3ad   : > { %s1623_s15 = smov 64   ;;  %s1624_s30 = smov 4   ;;  %v897_v36 = vlaneseq  ;;  %vm908_vm11 = vcmask 130112   ;;  %vm921_vm12 = vcmask 122880  }
 0x3ae   : > { %1324 = dma.vmem_to_hbm [thread:$0]  (%p1763_p11), %s1906_s14, 256, %s1912_s18, %s978_s22, %s1623_s15, %s1623_s15, %s1624_s30  }
 0x3af   : > { %v898_v38 = vand.u32 127, %v897_v36  ;;  %v900_v39 = vshrl.u32 %v897_v36, 7  ;;  %s1240_s9 = sshll.u32 %s1823_s10, 2  ;;  %s1283_s18 = sshll.u32 %s1603_s27, 6 }
 0x3b0   : > { %s384_s1 = scalar_lea.vmem [#allocation7], %s1240_s9  ;;  %s1951_s13 = scalar_lea.hbm %s2006_s5, %s1283_s18 }
 0x3b1   : > { %v903_v40 = vadd.s32 4294967288, %v898_v38  ;;  %v901_v42 = vsub.s32 %v898_v38, %v900_v39  ;;  %s992_s14 = sshll.u32 %s384_s1, 4  ;;  %s963_s20 = scalar_lea.sflag [#allocation4], %s1823_s10  ;;  %s1946_s14 = int_to_ptr.vmem [resolvable:$true] %s992_s14 }
 0x3b2   : > { %s1521_s16 = scalar_lea.vmem %s1946_s14, 64  ;;  %s1625_s27 = smov [#allocation7]  }
 0x3b3   : > { %v906_v43 = vsub.s32 %v903_v40, %v900_v39  ;;  %p1522_p10 = scmp.ne.s32.totalorder %s1946_s14, %s1521_s16  ;;  %s1525_s21 = sshll.u32 %s1625_s27, 4  ;;  %s1526_s21 = int_to_ptr.vmem [resolvable:$false] %s1525_s21 }
 0x3b4   : > { %s1527_s19 = scalar_lea.vmem %s1526_s21, 128  ;;  %p1528_p9 = scmp.lt.s32.totalorder %s1946_s14, %s1526_s21 }
 0x3b5   : > { %p1523_p0 = pnand %p1522_p10, %p1763_p11  ;;  %p1529_p1 = scmp.lt.s32.totalorder %s1527_s19, %s1521_s16 }
 0x3b7   : > { %p1524_p5 = pneg %p1523_p0  ;;  %p1530_p2 = por %p1529_p1, %p1528_p9 }
 0x3b9   : > { %p1531_p3 = pnand %p1530_p2, %p1524_p5 }
 0x3f0   : > { %v887_v41 = vpop.permute.xlu1 %886 }
 0x3f1   : > { %v902_v45 = vrot.slane %v887_v41, %v901_v42 }
 0x3f4   : > { %v890_v44 = vpop.permute.xlu1 %889  ;;  %v896_v47 = vpop.permute.xlu0 %895 }
 0x3f5   : > { %v907_v46 = vrot.slane %v890_v44, %v906_v43  ;;  %v917_v50 = vrot.slane %v896_v47, %v906_v43 }
 0x3f7   : > { %v909_v48 = vsel %vm908_vm11, %v907_v46, %v902_v45 }
 0x3f8   : > { %922 = vst.msk [vmem:[%s384_s1] sm:$0x1] %vm921_vm12, %v909_v48  ;;  %v893_v49 = vpop.permute.xlu1 %892 }
 0x3f9   : > { %v913_v51 = vrot.slane %v893_v49, %v901_v42 }
 0x3fb   : > { %v918_v52 = vsel %vm908_vm11, %v917_v50, %v913_v51 }
 0x3fc   : > { %923 = vst.msk [vmem:[%s384_s1 + $0x2] sm:$0x1] %vm921_vm12, %v918_v52 }
 0x413   : > { %v930_v53 = vpop.permute.xlu1 %929 }
 0x414   : > { %v943_v55 = vrot.slane %v930_v53, %v901_v42 }
 0x417   : > { %v933_v54 = vpop.permute.xlu1 %932 }
 0x418   : > { %v947_v56 = vrot.slane %v933_v54, %v906_v43 }
 0x41a   : > { %v948_v57 = vsel %vm908_vm11, %v947_v56, %v943_v55 }
 0x41b   : > { %960 = vst.msk [vmem:[%s384_s1 + $0x1] sm:$0x1] %vm921_vm12, %v948_v57  ;;  %v936_v58 = vpop.permute.xlu1 %935 }
 0x41c   : > { %v952_v60 = vrot.slane %v936_v58, %v901_v42 }
 0x41f   : > { %v939_v59 = vpop.permute.xlu1 %938 }
 0x420   : > { %v956_v61 = vrot.slane %v939_v59, %v906_v43 }
 0x422   : > { %v957_v62 = vsel %vm908_vm11, %v956_v61, %v952_v60 }
 0x423   : > { %961 = vst.msk [vmem:[%s384_s1 + $0x3] sm:$0x1] %vm921_vm12, %v957_v62 }
 0x424   : > { %1534 = shalt.err (!%p1531_p3)
}
 0x425   : > { %s1535_s15 = scalar_lea.hbm %s1951_s13, 64  ;;  %s1539_s1 = scalar_lea.hbm %s2006_s5, 256 }
 0x426   : > { %p1536_p7 = scmp.ne.s32.totalorder %s1951_s13, %s1535_s15  ;;  %p1540_p6 = scmp.lt.u32.totalorder %s1951_s13, %s2006_s5 }
 0x427   : > { %p1541_p8 = scmp.lt.u32.totalorder %s1539_s1, %s1535_s15  ;;  %p1543_p10 = scmp.lt.u32.totalorder %s1535_s15, %s1951_s13 }
 0x428   : > { %p1537_p13 = pnand %p1536_p7, %p1763_p11 }
 0x429   : > { %p1542_p12 = por %p1541_p8, %p1540_p6 }
 0x42a   : > { %p1538_p4 = pneg %p1537_p13 }
 0x42b   : > { %p1544_p0 = por %p1543_p10, %p1542_p12 }
 0x42d   : > { %p1545_p5 = pnand %p1544_p0, %p1538_p4 }
 0x42f   : > { %1548 = shalt.err (!%p1545_p5)
}
 0x430   : > { %s1626_s11 = smov 32   ;;  %s1627_s16 = smov 2  }
 0x431   : > { %1323 = dma.vmem_to_hbm [thread:$0]  (%p1763_p11), %s1946_s14, 64, %s1951_s13, %s963_s20, %s1626_s11, %s1626_s11, %s1627_s16  }
 0x432 PF: > { %p1345_p9 = scmp.ge.s32.totalorder %s1611_s29, 2  ;;  %s1031_s27 = sand.u32 1, %s1591_s24  }
 0x433   : > { %p2028_p1 = scmp.ne.s32.totalorder %s2017_s12, 0  ;;  %s1032_s21 = scalar_lea.sflag [#allocation4], %s1031_s27 }
 0x435   : > { %p1336_p2 = pnand %p1345_p9, %p2028_p1 }
 0x437   : > { %1582 = dma.done.wait (!%p1336_p2), %s1032_s21, 64  }
 0x438   : > { %1584 = vsyncadd (!%p1336_p2), %s1032_s21, 4294967232  ;;  %s1054_s19 = scalar_lea.sflag [#allocation9], %s1031_s27 }
 0x439   : > { %1586 = dma.done.wait (!%p1336_p2), %s1054_s19, 256  }
 0x43a   : > { %1588 = vsyncadd (!%p1336_p2), %s1054_s19, 4294967040  ;;  %s28_s29 = sadd.s32 1, %s1611_s29   ;;  %s2029_s24 = smov %s1595_s25 }
 0x43b   : > { %p25_p3 = scmp.ge.s32.totalorder %s28_s29, 6   ;;  %s2030_s25 = smov %s1599_s26 }
 0x43c   : > { %s2031_s26 = smov %s1772_s8  ;;  %s2032_s27 = smov %s1607_s28 }
 0x43d   : > { %s2033_s28 = smov %s2035_s17  ;;  %27 = sbr.rel (!%p25_p3) target bundleno = 11 (0xb), region = 129 }
 0x444   :  { %1059 = vsyncpa [#allocation3], 1 }
 0x445   :  { %1061 = vsyncpa [#allocation3 + $0x1], 1 }
 0x446   :  { %1062 = vsyncpa [#allocation6], 1 }
 0x447   :  { %1064 = vsyncpa [#allocation6 + $0x1], 1 }
 0x448   :  { %1065 = vsyncpa [#allocation4], 1 }
 0x449   :  { %1067 = vsyncpa [#allocation4 + $0x1], 1 }
 0x44a   :  { %1068 = vsyncpa [#allocation9], 1 }
 0x44b   :  { %1070 = vsyncpa [#allocation9 + $0x1], 1 }

</bundles_post_ra>
